<compile_context>
chip_gen: v5e
topology: v5e:2x2
jax: 0.10.0
libtpu: 0.0.40
codegen_flags: <defaults>
</compile_context>

<pallas_src>
import functools

import jax
import jax.numpy as jnp
from jax.experimental import pallas as pl
from jax.experimental.pallas import tpu as pltpu

# ----- small, self-consistent shapes -----
SEQ = 8        # sequence length
BATCH = 4      # batch size (per sentence)
VOCAB = 64     # toy vocabulary
EMB = 32       # embedder.dim
RNN = 32       # rnn_dim (per direction)
FC = 64        # fc_dim
NCLS = 3       # n_classes

G8 = 8 * RNN   # 256 gate columns, interleaved [i_f|i_b|f_f|f_b|g_f|g_b|o_f|o_b]
D2 = 2 * RNN   # 64 hidden columns [h_fwd | h_bwd]
OUT_ROWS = 8
OUT_LANES = 128


# ---------------------------------------------------------------------------
# Single fused kernel: BiLSTM-max encoder (both sentences, both directions)
#                      + feature combination + 2-layer classifier + CE loss
# ---------------------------------------------------------------------------
def snli_fused_kernel(x_ref,       # (SEQ*2B, EMB)        bf16 embedded tokens
                      wrnn_ref,    # (2*EMB+2*RNN, 8*RNN) bf16 [P_f; P_b; Whh_blockdiag]
                      w1_ref,      # (8*RNN, FC)          bf16
                      w2_ref,      # (FC, NCLS)           bf16
                      smalls_ref,  # (8, 8*RNN) f32: bias | b1 | b2 | onehot rows
                      out_ref,     # (8, 128) f32: logits rows 0:B, loss at [B, 0]
                      *, seq, batch):
    emb = x_ref.shape[1]
    g8 = wrnn_ref.shape[1]
    d2 = g8 // 4
    fc = w1_ref.shape[1]
    ncls = w2_ref.shape[1]
    bat2 = 2 * batch

    # ---- weights: bf16 for the MXU; all VPU/EUP math stays f32 ----
    wrnn = wrnn_ref[...]
    p_f = wrnn[0:emb, :]               # fwd input proj   (i/f/o cols pre-scaled 0.5)
    p_b = wrnn[emb:2 * emb, :]         # bwd input proj
    whh = wrnn[2 * emb:, :]            # block-diag recurrent proj (2*RNN, 8*RNN)

    smalls = smalls_ref[...]
    bias = jnp.broadcast_to(smalls[0:1, :], (bat2, g8))     # hoisted, pre-scaled
    b1 = smalls[1:2, 0:fc]
    b2c = smalls[2:3, 0:ncls]
    onehot = smalls[3:3 + batch, 0:ncls]

    # ---- input projection hoisted out of the recurrence:
    #      one M=SEQ*2B matmul per direction instead of 8 tiny per-step issues ----
    x = x_ref[...]                                               # (SEQ*2B, EMB) bf16
    xw_f = jnp.dot(x, p_f, preferred_element_type=jnp.float32)   # (SEQ*2B, 8*RNN) f32
    xw_b = jnp.dot(x, p_b, preferred_element_type=jnp.float32)

    # ---- fully unrolled fused BiLSTM recurrence (fwd+bwd, both sentences) ----
    h = jnp.zeros((bat2, d2), jnp.float32)
    c = jnp.zeros((bat2, d2), jnp.float32)
    m = jnp.full((bat2, d2), -jnp.inf, jnp.float32)   # SEQ > 0, so -inf never leaks

    for t in range(seq):
        # Off the serial chain: static row slices of the precomputed projections.
        xw_t = (xw_f[t * bat2:(t + 1) * bat2, :]
                + xw_b[(seq - 1 - t) * bat2:(seq - t) * bat2, :]
                + bias)
        # Serial chain: dot(h, Whh) + add + one full-width tanh + VPU gate math.
        z = xw_t + jnp.dot(h.astype(jnp.bfloat16), whh,
                           preferred_element_type=jnp.float32)   # (2B, 8*RNN) f32
        # i/f/o gate columns were pre-scaled by 0.5, so one tanh push yields
        # tanh(z) for g and tanh(z/2) for i/f/o; sigmoid(z) = 0.5*tanh(z/2)+0.5.
        th = jnp.tanh(z)
        sg = 0.5 * th + 0.5
        i_g = sg[:, 0 * d2:1 * d2]                               # [i_fwd | i_bwd]
        f_g = sg[:, 1 * d2:2 * d2]
        g_g = th[:, 2 * d2:3 * d2]
        o_g = sg[:, 3 * d2:4 * d2]
        c = f_g * c + i_g * g_g
        h = o_g * jnp.tanh(c)
        m = jnp.maximum(m, h)                                    # max-pool over time

    # TODO(synk): no sequence-length masking — padded timesteps participate in the
    # max-pool; real SNLI batches with padding need a length mask here.

    u = m[0:batch, :]                                            # premise encoding
    v = m[batch:bat2, :]                                         # hypothesis encoding
    combined = jnp.concatenate([u, v, jnp.abs(u - v), u * v], axis=1)   # (B, 8*RNN)

    hidden = jnp.dot(combined.astype(jnp.bfloat16), w1_ref[...],
                     preferred_element_type=jnp.float32) + b1
    hidden = jnp.maximum(hidden, 0.0)                            # ReLU
    # TODO(synk): nn.Dropout(clf_dropout) is identity in eval mode; training-mode
    # dropout masking is not applied here.
    logits = jnp.dot(hidden.astype(jnp.bfloat16), w2_ref[...],
                     preferred_element_type=jnp.float32) + b2c   # (B, NCLS)

    # CrossEntropyLoss (mean over batch) via stable logsumexp + one-hot labels.
    mx = jnp.max(logits, axis=1, keepdims=True)
    lse = jnp.log(jnp.sum(jnp.exp(logits - mx), axis=1, keepdims=True)) + mx
    picked = jnp.sum(logits * onehot, axis=1, keepdims=True)
    loss = jnp.sum(lse - picked, axis=0, keepdims=True) * (1.0 / batch)  # (1,1)

    # ---- single lane-dense (8,128) output slab: one unmasked tile store ----
    out_rows, out_lanes = out_ref.shape
    top = jnp.concatenate(
        [logits, jnp.zeros((batch, out_lanes - ncls), jnp.float32)], axis=1)
    loss_row = jnp.broadcast_to(loss, (1, out_lanes))
    pad_rows = jnp.zeros((out_rows - batch - 1, out_lanes), jnp.float32)
    out_ref[...] = jnp.concatenate([top, loss_row, pad_rows], axis=0)


# ---------------------------------------------------------------------------
# Host-side weight re-layout (traced JAX, one-time, tiny):
# gate-interleaved columns [i_f|i_b|f_f|f_b|g_f|g_b|o_f|o_b] (PyTorch order i,f,g,o),
# block-diagonal over directions, i/f/o columns pre-scaled by 0.5 (tanh-half trick).
# ---------------------------------------------------------------------------
def _gate_scatter(w, rnn, direction):
    """Scatter one direction's [i|f|g|o] blocks into the interleaved column layout."""
    out = jnp.zeros((w.shape[0], 8 * rnn), jnp.float32)
    for k in range(4):
        col = k * 2 * rnn + direction * rnn
        out = out.at[:, col:col + rnn].set(w[:, k * rnn:(k + 1) * rnn])
    return out


def _gate_scale(rnn):
    """0.5 on i/f/o gate columns (sigmoid via tanh-half), 1.0 on g columns."""
    s = jnp.ones((1, 8 * rnn), jnp.float32)
    for k in (0, 1, 3):
        s = s.at[:, k * 2 * rnn:(k + 1) * 2 * rnn].set(0.5)
    return s


# ---------------------------------------------------------------------------
# Parameter init (deterministic, synthetic) + end-to-end forward
# ---------------------------------------------------------------------------
def init_params(key):
    ks = jax.random.split(key, 12)
    s = 0.1
    return {
        "embedding": s * jax.random.normal(ks[0], (VOCAB, EMB), jnp.float32),
        # BiLSTM (shared by premise & hypothesis), weights transposed, gates i,f,g,o.
        "wih_f": s * jax.random.normal(ks[1], (EMB, 4 * RNN), jnp.float32),
        "whh_f": s * jax.random.normal(ks[2], (RNN, 4 * RNN), jnp.float32),
        "b_f":   s * jax.random.normal(ks[3], (1, 4 * RNN), jnp.float32),
        "wih_b": s * jax.random.normal(ks[4], (EMB, 4 * RNN), jnp.float32),
        "whh_b": s * jax.random.normal(ks[5], (RNN, 4 * RNN), jnp.float32),
        "b_b":   s * jax.random.normal(ks[6], (1, 4 * RNN), jnp.float32),
        # Classifier: Linear(4*2*RNN -> FC), ReLU, Dropout, Linear(FC -> NCLS)
        "w1": s * jax.random.normal(ks[7], (4 * 2 * RNN, FC), jnp.float32),
        "b1": s * jax.random.normal(ks[8], (1, FC), jnp.float32),
        "w2": s * jax.random.normal(ks[9], (FC, NCLS), jnp.float32),
        "b2": s * jax.random.normal(ks[10], (1, NCLS), jnp.float32),
    }


@jax.jit
def snli_forward(premise_tok, hypothesis_tok, labels, params):
    # embedder (glue): gather both sentences at once -> combined batch of 2B.
    tok = jnp.concatenate([premise_tok, hypothesis_tok], axis=1)        # (SEQ, 2B)
    emb = params["embedding"][tok]                                      # (SEQ, 2B, EMB)
    x_flat = emb.reshape(SEQ * 2 * BATCH, EMB).astype(jnp.bfloat16)     # (SEQ*2B, EMB)
    # TODO(synk): fuse this embedding gather into the kernel (SMEM token ids +
    # in-kernel take) to drop the standalone XLA gather and the HBM bounce of emb.

    scale = _gate_scale(RNN)
    p_f = _gate_scatter(params["wih_f"], RNN, 0) * scale                # (EMB, 8*RNN)
    p_b = _gate_scatter(params["wih_b"], RNN, 1) * scale
    whh = jnp.concatenate(
        [_gate_scatter(params["whh_f"], RNN, 0),
         _gate_scatter(params["whh_b"], RNN, 1)], axis=0) * scale       # (2*RNN, 8*RNN)
    w_rnn = jnp.concatenate([p_f, p_b, whh], axis=0).astype(jnp.bfloat16)  # (128, 256)

    bias = (_gate_scatter(params["b_f"], RNN, 0)
            + _gate_scatter(params["b_b"], RNN, 1)) * scale             # (1, 8*RNN)
    onehot = jax.nn.one_hot(labels, NCLS, dtype=jnp.float32)            # (B, NCLS)

    # Pack all sub-tile-sized params into ONE f32 (8, 256) array -> one DMA.
    smalls = jnp.zeros((8, G8), jnp.float32)
    smalls = smalls.at[0:1, :].set(bias)
    smalls = smalls.at[1, 0:FC].set(params["b1"][0])
    smalls = smalls.at[2, 0:NCLS].set(params["b2"][0])
    smalls = smalls.at[3:3 + BATCH, 0:NCLS].set(onehot)

    w1_bf = params["w1"].astype(jnp.bfloat16)
    w2_bf = params["w2"].astype(jnp.bfloat16)

    vmem = pl.BlockSpec(memory_space=pltpu.MemorySpace.VMEM)
    out = pl.pallas_call(
        functools.partial(snli_fused_kernel, seq=SEQ, batch=BATCH),
        out_shape=jax.ShapeDtypeStruct((OUT_ROWS, OUT_LANES), jnp.float32),
        in_specs=[vmem] * 5,
        out_specs=vmem,
        cost_estimate=pl.CostEstimate(
            flops=4_400_000, transcendentals=21_000, bytes_accessed=116_000),
    )(x_flat, w_rnn, w1_bf, w2_bf, smalls)

    logits = out[0:BATCH, 0:NCLS]
    loss = out[BATCH, 0]
    return loss, logits


if __name__ == "__main__":
    key = jax.random.PRNGKey(0)
    k_par, k_p, k_h, k_l = jax.random.split(key, 4)

    params = init_params(k_par)
    premise = jax.random.randint(k_p, (SEQ, BATCH), 0, VOCAB, dtype=jnp.int32)
    hypothesis = jax.random.randint(k_h, (SEQ, BATCH), 0, VOCAB, dtype=jnp.int32)
    labels = jax.random.randint(k_l, (BATCH,), 0, NCLS, dtype=jnp.int32)

    loss, logits = snli_forward(premise, hypothesis, labels, params)
    jax.block_until_ready((loss, logits))

    assert logits.shape == (BATCH, NCLS)
    assert loss.shape == ()
    assert bool(jnp.isfinite(loss)) and bool(jnp.all(jnp.isfinite(logits)))
    print("KERNEL_OK")
</pallas_src>

<mosaic_0001>
module attributes {stable_mosaic.version = 11 : i64} {
  func.func @snli_fused_kernel(%arg0: memref<64x32xbf16, #tpu.memory_space<vmem>>, %arg1: memref<128x256xbf16, #tpu.memory_space<vmem>>, %arg2: memref<256x64xbf16, #tpu.memory_space<vmem>>, %arg3: memref<64x3xbf16, #tpu.memory_space<vmem>>, %arg4: memref<8x256xf32, #tpu.memory_space<vmem>>, %arg5: memref<8x128xf32, #tpu.memory_space<vmem>>) attributes {dimension_semantics = [], scalar_prefetch = 0 : i64, scratch_operands = 0 : i64, tpu.core_type = #tpu.core_type<tc>} {
    %c0 = arith.constant 0 : index
    %c0_0 = arith.constant 0 : index
    %0 = vector.load %arg1[%c0, %c0_0] : memref<128x256xbf16, #tpu.memory_space<vmem>>, vector<128x256xbf16>
    %1 = vector.extract_strided_slice %0 {offsets = [0, 0], sizes = [32, 256], strides = [1, 1]} : vector<128x256xbf16> to vector<32x256xbf16>
    %2 = vector.extract_strided_slice %0 {offsets = [32, 0], sizes = [32, 256], strides = [1, 1]} : vector<128x256xbf16> to vector<32x256xbf16>
    %3 = vector.extract_strided_slice %0 {offsets = [64, 0], sizes = [64, 256], strides = [1, 1]} : vector<128x256xbf16> to vector<64x256xbf16>
    %c0_1 = arith.constant 0 : index
    %c0_2 = arith.constant 0 : index
    %4 = vector.load %arg4[%c0_1, %c0_2] : memref<8x256xf32, #tpu.memory_space<vmem>>, vector<8x256xf32>
    %5 = vector.extract_strided_slice %4 {offsets = [0, 0], sizes = [1, 256], strides = [1, 1]} : vector<8x256xf32> to vector<1x256xf32>
    %6 = vector.shape_cast %5 : vector<1x256xf32> to vector<1x256xf32>
    %7 = vector.broadcast %6 : vector<1x256xf32> to vector<8x256xf32>
    %8 = vector.extract_strided_slice %4 {offsets = [1, 0], sizes = [1, 64], strides = [1, 1]} : vector<8x256xf32> to vector<1x64xf32>
    %9 = vector.extract_strided_slice %4 {offsets = [2, 0], sizes = [1, 3], strides = [1, 1]} : vector<8x256xf32> to vector<1x3xf32>
    %10 = vector.extract_strided_slice %4 {offsets = [3, 0], sizes = [4, 3], strides = [1, 1]} : vector<8x256xf32> to vector<4x3xf32>
    %c0_3 = arith.constant 0 : index
    %c0_4 = arith.constant 0 : index
    %11 = vector.load %arg0[%c0_3, %c0_4] : memref<64x32xbf16, #tpu.memory_space<vmem>>, vector<64x32xbf16>
    %cst = arith.constant dense<0.000000e+00> : vector<64x256xf32>
    %12 = tpu.matmul %11, %1, %cst {dimension_numbers = #tpu.dot_dimension_numbers<[1], [0], [0], [1], [0, 0, 1, 1], [], []>} : vector<64x32xbf16>, vector<32x256xbf16>, vector<64x256xf32> -> vector<64x256xf32>
    %cst_5 = arith.constant dense<0.000000e+00> : vector<64x256xf32>
    %13 = tpu.matmul %11, %2, %cst_5 {dimension_numbers = #tpu.dot_dimension_numbers<[1], [0], [0], [1], [0, 0, 1, 1], [], []>} : vector<64x32xbf16>, vector<32x256xbf16>, vector<64x256xf32> -> vector<64x256xf32>
    %cst_6 = arith.constant 0.000000e+00 : f32
    %14 = vector.broadcast %cst_6 : f32 to vector<8x64xf32>
    %cst_7 = arith.constant 0.000000e+00 : f32
    %15 = vector.broadcast %cst_7 : f32 to vector<8x64xf32>
    %cst_8 = arith.constant 0xFF800000 : f32
    %16 = vector.broadcast %cst_8 : f32 to vector<8x64xf32>
    %17 = vector.extract_strided_slice %12 {offsets = [0, 0], sizes = [8, 256], strides = [1, 1]} : vector<64x256xf32> to vector<8x256xf32>
    %18 = vector.extract_strided_slice %13 {offsets = [56, 0], sizes = [8, 256], strides = [1, 1]} : vector<64x256xf32> to vector<8x256xf32>
    %19 = arith.addf %17, %18 : vector<8x256xf32>
    %20 = arith.addf %19, %7 : vector<8x256xf32>
    %21 = arith.truncf %14 : vector<8x64xf32> to vector<8x64xbf16>
    %cst_9 = arith.constant dense<0.000000e+00> : vector<8x256xf32>
    %22 = tpu.matmul %21, %3, %cst_9 {dimension_numbers = #tpu.dot_dimension_numbers<[1], [0], [0], [1], [0, 0, 1, 1], [], []>} : vector<8x64xbf16>, vector<64x256xbf16>, vector<8x256xf32> -> vector<8x256xf32>
    %23 = arith.addf %20, %22 : vector<8x256xf32>
    %24 = math.tanh %23 : vector<8x256xf32>
    %cst_10 = arith.constant 5.000000e-01 : f32
    %25 = vector.broadcast %cst_10 : f32 to vector<8x256xf32>
    %26 = arith.mulf %25, %24 : vector<8x256xf32>
    %cst_11 = arith.constant 5.000000e-01 : f32
    %27 = vector.broadcast %cst_11 : f32 to vector<8x256xf32>
    %28 = arith.addf %26, %27 : vector<8x256xf32>
    %29 = vector.extract_strided_slice %28 {offsets = [0, 0], sizes = [8, 64], strides = [1, 1]} : vector<8x256xf32> to vector<8x64xf32>
    %30 = vector.extract_strided_slice %28 {offsets = [0, 64], sizes = [8, 64], strides = [1, 1]} : vector<8x256xf32> to vector<8x64xf32>
    %31 = vector.extract_strided_slice %24 {offsets = [0, 128], sizes = [8, 64], strides = [1, 1]} : vector<8x256xf32> to vector<8x64xf32>
    %32 = vector.extract_strided_slice %28 {offsets = [0, 192], sizes = [8, 64], strides = [1, 1]} : vector<8x256xf32> to vector<8x64xf32>
    %33 = arith.mulf %30, %15 : vector<8x64xf32>
    %34 = arith.mulf %29, %31 : vector<8x64xf32>
    %35 = arith.addf %33, %34 : vector<8x64xf32>
    %36 = math.tanh %35 : vector<8x64xf32>
    %37 = arith.mulf %32, %36 : vector<8x64xf32>
    %38 = arith.maximumf %16, %37 : vector<8x64xf32>
    %39 = vector.extract_strided_slice %12 {offsets = [8, 0], sizes = [8, 256], strides = [1, 1]} : vector<64x256xf32> to vector<8x256xf32>
    %40 = vector.extract_strided_slice %13 {offsets = [48, 0], sizes = [8, 256], strides = [1, 1]} : vector<64x256xf32> to vector<8x256xf32>
    %41 = arith.addf %39, %40 : vector<8x256xf32>
    %42 = arith.addf %41, %7 : vector<8x256xf32>
    %43 = arith.truncf %37 : vector<8x64xf32> to vector<8x64xbf16>
    %cst_12 = arith.constant dense<0.000000e+00> : vector<8x256xf32>
    %44 = tpu.matmul %43, %3, %cst_12 {dimension_numbers = #tpu.dot_dimension_numbers<[1], [0], [0], [1], [0, 0, 1, 1], [], []>} : vector<8x64xbf16>, vector<64x256xbf16>, vector<8x256xf32> -> vector<8x256xf32>
    %45 = arith.addf %42, %44 : vector<8x256xf32>
    %46 = math.tanh %45 : vector<8x256xf32>
    %cst_13 = arith.constant 5.000000e-01 : f32
    %47 = vector.broadcast %cst_13 : f32 to vector<8x256xf32>
    %48 = arith.mulf %47, %46 : vector<8x256xf32>
    %cst_14 = arith.constant 5.000000e-01 : f32
    %49 = vector.broadcast %cst_14 : f32 to vector<8x256xf32>
    %50 = arith.addf %48, %49 : vector<8x256xf32>
    %51 = vector.extract_strided_slice %50 {offsets = [0, 0], sizes = [8, 64], strides = [1, 1]} : vector<8x256xf32> to vector<8x64xf32>
    %52 = vector.extract_strided_slice %50 {offsets = [0, 64], sizes = [8, 64], strides = [1, 1]} : vector<8x256xf32> to vector<8x64xf32>
    %53 = vector.extract_strided_slice %46 {offsets = [0, 128], sizes = [8, 64], strides = [1, 1]} : vector<8x256xf32> to vector<8x64xf32>
    %54 = vector.extract_strided_slice %50 {offsets = [0, 192], sizes = [8, 64], strides = [1, 1]} : vector<8x256xf32> to vector<8x64xf32>
    %55 = arith.mulf %52, %35 : vector<8x64xf32>
    %56 = arith.mulf %51, %53 : vector<8x64xf32>
    %57 = arith.addf %55, %56 : vector<8x64xf32>
    %58 = math.tanh %57 : vector<8x64xf32>
    %59 = arith.mulf %54, %58 : vector<8x64xf32>
    %60 = arith.maximumf %38, %59 : vector<8x64xf32>
    %61 = vector.extract_strided_slice %12 {offsets = [16, 0], sizes = [8, 256], strides = [1, 1]} : vector<64x256xf32> to vector<8x256xf32>
    %62 = vector.extract_strided_slice %13 {offsets = [40, 0], sizes = [8, 256], strides = [1, 1]} : vector<64x256xf32> to vector<8x256xf32>
    %63 = arith.addf %61, %62 : vector<8x256xf32>
    %64 = arith.addf %63, %7 : vector<8x256xf32>
    %65 = arith.truncf %59 : vector<8x64xf32> to vector<8x64xbf16>
    %cst_15 = arith.constant dense<0.000000e+00> : vector<8x256xf32>
    %66 = tpu.matmul %65, %3, %cst_15 {dimension_numbers = #tpu.dot_dimension_numbers<[1], [0], [0], [1], [0, 0, 1, 1], [], []>} : vector<8x64xbf16>, vector<64x256xbf16>, vector<8x256xf32> -> vector<8x256xf32>
    %67 = arith.addf %64, %66 : vector<8x256xf32>
    %68 = math.tanh %67 : vector<8x256xf32>
    %cst_16 = arith.constant 5.000000e-01 : f32
    %69 = vector.broadcast %cst_16 : f32 to vector<8x256xf32>
    %70 = arith.mulf %69, %68 : vector<8x256xf32>
    %cst_17 = arith.constant 5.000000e-01 : f32
    %71 = vector.broadcast %cst_17 : f32 to vector<8x256xf32>
    %72 = arith.addf %70, %71 : vector<8x256xf32>
    %73 = vector.extract_strided_slice %72 {offsets = [0, 0], sizes = [8, 64], strides = [1, 1]} : vector<8x256xf32> to vector<8x64xf32>
    %74 = vector.extract_strided_slice %72 {offsets = [0, 64], sizes = [8, 64], strides = [1, 1]} : vector<8x256xf32> to vector<8x64xf32>
    %75 = vector.extract_strided_slice %68 {offsets = [0, 128], sizes = [8, 64], strides = [1, 1]} : vector<8x256xf32> to vector<8x64xf32>
    %76 = vector.extract_strided_slice %72 {offsets = [0, 192], sizes = [8, 64], strides = [1, 1]} : vector<8x256xf32> to vector<8x64xf32>
    %77 = arith.mulf %74, %57 : vector<8x64xf32>
    %78 = arith.mulf %73, %75 : vector<8x64xf32>
    %79 = arith.addf %77, %78 : vector<8x64xf32>
    %80 = math.tanh %79 : vector<8x64xf32>
    %81 = arith.mulf %76, %80 : vector<8x64xf32>
    %82 = arith.maximumf %60, %81 : vector<8x64xf32>
    %83 = vector.extract_strided_slice %12 {offsets = [24, 0], sizes = [8, 256], strides = [1, 1]} : vector<64x256xf32> to vector<8x256xf32>
    %84 = vector.extract_strided_slice %13 {offsets = [32, 0], sizes = [8, 256], strides = [1, 1]} : vector<64x256xf32> to vector<8x256xf32>
    %85 = arith.addf %83, %84 : vector<8x256xf32>
    %86 = arith.addf %85, %7 : vector<8x256xf32>
    %87 = arith.truncf %81 : vector<8x64xf32> to vector<8x64xbf16>
    %cst_18 = arith.constant dense<0.000000e+00> : vector<8x256xf32>
    %88 = tpu.matmul %87, %3, %cst_18 {dimension_numbers = #tpu.dot_dimension_numbers<[1], [0], [0], [1], [0, 0, 1, 1], [], []>} : vector<8x64xbf16>, vector<64x256xbf16>, vector<8x256xf32> -> vector<8x256xf32>
    %89 = arith.addf %86, %88 : vector<8x256xf32>
    %90 = math.tanh %89 : vector<8x256xf32>
    %cst_19 = arith.constant 5.000000e-01 : f32
    %91 = vector.broadcast %cst_19 : f32 to vector<8x256xf32>
    %92 = arith.mulf %91, %90 : vector<8x256xf32>
    %cst_20 = arith.constant 5.000000e-01 : f32
    %93 = vector.broadcast %cst_20 : f32 to vector<8x256xf32>
    %94 = arith.addf %92, %93 : vector<8x256xf32>
    %95 = vector.extract_strided_slice %94 {offsets = [0, 0], sizes = [8, 64], strides = [1, 1]} : vector<8x256xf32> to vector<8x64xf32>
    %96 = vector.extract_strided_slice %94 {offsets = [0, 64], sizes = [8, 64], strides = [1, 1]} : vector<8x256xf32> to vector<8x64xf32>
    %97 = vector.extract_strided_slice %90 {offsets = [0, 128], sizes = [8, 64], strides = [1, 1]} : vector<8x256xf32> to vector<8x64xf32>
    %98 = vector.extract_strided_slice %94 {offsets = [0, 192], sizes = [8, 64], strides = [1, 1]} : vector<8x256xf32> to vector<8x64xf32>
    %99 = arith.mulf %96, %79 : vector<8x64xf32>
    %100 = arith.mulf %95, %97 : vector<8x64xf32>
    %101 = arith.addf %99, %100 : vector<8x64xf32>
    %102 = math.tanh %101 : vector<8x64xf32>
    %103 = arith.mulf %98, %102 : vector<8x64xf32>
    %104 = arith.maximumf %82, %103 : vector<8x64xf32>
    %105 = vector.extract_strided_slice %12 {offsets = [32, 0], sizes = [8, 256], strides = [1, 1]} : vector<64x256xf32> to vector<8x256xf32>
    %106 = vector.extract_strided_slice %13 {offsets = [24, 0], sizes = [8, 256], strides = [1, 1]} : vector<64x256xf32> to vector<8x256xf32>
    %107 = arith.addf %105, %106 : vector<8x256xf32>
    %108 = arith.addf %107, %7 : vector<8x256xf32>
    %109 = arith.truncf %103 : vector<8x64xf32> to vector<8x64xbf16>
    %cst_21 = arith.constant dense<0.000000e+00> : vector<8x256xf32>
    %110 = tpu.matmul %109, %3, %cst_21 {dimension_numbers = #tpu.dot_dimension_numbers<[1], [0], [0], [1], [0, 0, 1, 1], [], []>} : vector<8x64xbf16>, vector<64x256xbf16>, vector<8x256xf32> -> vector<8x256xf32>
    %111 = arith.addf %108, %110 : vector<8x256xf32>
    %112 = math.tanh %111 : vector<8x256xf32>
    %cst_22 = arith.constant 5.000000e-01 : f32
    %113 = vector.broadcast %cst_22 : f32 to vector<8x256xf32>
    %114 = arith.mulf %113, %112 : vector<8x256xf32>
    %cst_23 = arith.constant 5.000000e-01 : f32
    %115 = vector.broadcast %cst_23 : f32 to vector<8x256xf32>
    %116 = arith.addf %114, %115 : vector<8x256xf32>
    %117 = vector.extract_strided_slice %116 {offsets = [0, 0], sizes = [8, 64], strides = [1, 1]} : vector<8x256xf32> to vector<8x64xf32>
    %118 = vector.extract_strided_slice %116 {offsets = [0, 64], sizes = [8, 64], strides = [1, 1]} : vector<8x256xf32> to vector<8x64xf32>
    %119 = vector.extract_strided_slice %112 {offsets = [0, 128], sizes = [8, 64], strides = [1, 1]} : vector<8x256xf32> to vector<8x64xf32>
    %120 = vector.extract_strided_slice %116 {offsets = [0, 192], sizes = [8, 64], strides = [1, 1]} : vector<8x256xf32> to vector<8x64xf32>
    %121 = arith.mulf %118, %101 : vector<8x64xf32>
    %122 = arith.mulf %117, %119 : vector<8x64xf32>
    %123 = arith.addf %121, %122 : vector<8x64xf32>
    %124 = math.tanh %123 : vector<8x64xf32>
    %125 = arith.mulf %120, %124 : vector<8x64xf32>
    %126 = arith.maximumf %104, %125 : vector<8x64xf32>
    %127 = vector.extract_strided_slice %12 {offsets = [40, 0], sizes = [8, 256], strides = [1, 1]} : vector<64x256xf32> to vector<8x256xf32>
    %128 = vector.extract_strided_slice %13 {offsets = [16, 0], sizes = [8, 256], strides = [1, 1]} : vector<64x256xf32> to vector<8x256xf32>
    %129 = arith.addf %127, %128 : vector<8x256xf32>
    %130 = arith.addf %129, %7 : vector<8x256xf32>
    %131 = arith.truncf %125 : vector<8x64xf32> to vector<8x64xbf16>
    %cst_24 = arith.constant dense<0.000000e+00> : vector<8x256xf32>
    %132 = tpu.matmul %131, %3, %cst_24 {dimension_numbers = #tpu.dot_dimension_numbers<[1], [0], [0], [1], [0, 0, 1, 1], [], []>} : vector<8x64xbf16>, vector<64x256xbf16>, vector<8x256xf32> -> vector<8x256xf32>
    %133 = arith.addf %130, %132 : vector<8x256xf32>
    %134 = math.tanh %133 : vector<8x256xf32>
    %cst_25 = arith.constant 5.000000e-01 : f32
    %135 = vector.broadcast %cst_25 : f32 to vector<8x256xf32>
    %136 = arith.mulf %135, %134 : vector<8x256xf32>
    %cst_26 = arith.constant 5.000000e-01 : f32
    %137 = vector.broadcast %cst_26 : f32 to vector<8x256xf32>
    %138 = arith.addf %136, %137 : vector<8x256xf32>
    %139 = vector.extract_strided_slice %138 {offsets = [0, 0], sizes = [8, 64], strides = [1, 1]} : vector<8x256xf32> to vector<8x64xf32>
    %140 = vector.extract_strided_slice %138 {offsets = [0, 64], sizes = [8, 64], strides = [1, 1]} : vector<8x256xf32> to vector<8x64xf32>
    %141 = vector.extract_strided_slice %134 {offsets = [0, 128], sizes = [8, 64], strides = [1, 1]} : vector<8x256xf32> to vector<8x64xf32>
    %142 = vector.extract_strided_slice %138 {offsets = [0, 192], sizes = [8, 64], strides = [1, 1]} : vector<8x256xf32> to vector<8x64xf32>
    %143 = arith.mulf %140, %123 : vector<8x64xf32>
    %144 = arith.mulf %139, %141 : vector<8x64xf32>
    %145 = arith.addf %143, %144 : vector<8x64xf32>
    %146 = math.tanh %145 : vector<8x64xf32>
    %147 = arith.mulf %142, %146 : vector<8x64xf32>
    %148 = arith.maximumf %126, %147 : vector<8x64xf32>
    %149 = vector.extract_strided_slice %12 {offsets = [48, 0], sizes = [8, 256], strides = [1, 1]} : vector<64x256xf32> to vector<8x256xf32>
    %150 = vector.extract_strided_slice %13 {offsets = [8, 0], sizes = [8, 256], strides = [1, 1]} : vector<64x256xf32> to vector<8x256xf32>
    %151 = arith.addf %149, %150 : vector<8x256xf32>
    %152 = arith.addf %151, %7 : vector<8x256xf32>
    %153 = arith.truncf %147 : vector<8x64xf32> to vector<8x64xbf16>
    %cst_27 = arith.constant dense<0.000000e+00> : vector<8x256xf32>
    %154 = tpu.matmul %153, %3, %cst_27 {dimension_numbers = #tpu.dot_dimension_numbers<[1], [0], [0], [1], [0, 0, 1, 1], [], []>} : vector<8x64xbf16>, vector<64x256xbf16>, vector<8x256xf32> -> vector<8x256xf32>
    %155 = arith.addf %152, %154 : vector<8x256xf32>
    %156 = math.tanh %155 : vector<8x256xf32>
    %cst_28 = arith.constant 5.000000e-01 : f32
    %157 = vector.broadcast %cst_28 : f32 to vector<8x256xf32>
    %158 = arith.mulf %157, %156 : vector<8x256xf32>
    %cst_29 = arith.constant 5.000000e-01 : f32
    %159 = vector.broadcast %cst_29 : f32 to vector<8x256xf32>
    %160 = arith.addf %158, %159 : vector<8x256xf32>
    %161 = vector.extract_strided_slice %160 {offsets = [0, 0], sizes = [8, 64], strides = [1, 1]} : vector<8x256xf32> to vector<8x64xf32>
    %162 = vector.extract_strided_slice %160 {offsets = [0, 64], sizes = [8, 64], strides = [1, 1]} : vector<8x256xf32> to vector<8x64xf32>
    %163 = vector.extract_strided_slice %156 {offsets = [0, 128], sizes = [8, 64], strides = [1, 1]} : vector<8x256xf32> to vector<8x64xf32>
    %164 = vector.extract_strided_slice %160 {offsets = [0, 192], sizes = [8, 64], strides = [1, 1]} : vector<8x256xf32> to vector<8x64xf32>
    %165 = arith.mulf %162, %145 : vector<8x64xf32>
    %166 = arith.mulf %161, %163 : vector<8x64xf32>
    %167 = arith.addf %165, %166 : vector<8x64xf32>
    %168 = math.tanh %167 : vector<8x64xf32>
    %169 = arith.mulf %164, %168 : vector<8x64xf32>
    %170 = arith.maximumf %148, %169 : vector<8x64xf32>
    %171 = vector.extract_strided_slice %12 {offsets = [56, 0], sizes = [8, 256], strides = [1, 1]} : vector<64x256xf32> to vector<8x256xf32>
    %172 = vector.extract_strided_slice %13 {offsets = [0, 0], sizes = [8, 256], strides = [1, 1]} : vector<64x256xf32> to vector<8x256xf32>
    %173 = arith.addf %171, %172 : vector<8x256xf32>
    %174 = arith.addf %173, %7 : vector<8x256xf32>
    %175 = arith.truncf %169 : vector<8x64xf32> to vector<8x64xbf16>
    %cst_30 = arith.constant dense<0.000000e+00> : vector<8x256xf32>
    %176 = tpu.matmul %175, %3, %cst_30 {dimension_numbers = #tpu.dot_dimension_numbers<[1], [0], [0], [1], [0, 0, 1, 1], [], []>} : vector<8x64xbf16>, vector<64x256xbf16>, vector<8x256xf32> -> vector<8x256xf32>
    %177 = arith.addf %174, %176 : vector<8x256xf32>
    %178 = math.tanh %177 : vector<8x256xf32>
    %cst_31 = arith.constant 5.000000e-01 : f32
    %179 = vector.broadcast %cst_31 : f32 to vector<8x256xf32>
    %180 = arith.mulf %179, %178 : vector<8x256xf32>
    %cst_32 = arith.constant 5.000000e-01 : f32
    %181 = vector.broadcast %cst_32 : f32 to vector<8x256xf32>
    %182 = arith.addf %180, %181 : vector<8x256xf32>
    %183 = vector.extract_strided_slice %182 {offsets = [0, 0], sizes = [8, 64], strides = [1, 1]} : vector<8x256xf32> to vector<8x64xf32>
    %184 = vector.extract_strided_slice %182 {offsets = [0, 64], sizes = [8, 64], strides = [1, 1]} : vector<8x256xf32> to vector<8x64xf32>
    %185 = vector.extract_strided_slice %178 {offsets = [0, 128], sizes = [8, 64], strides = [1, 1]} : vector<8x256xf32> to vector<8x64xf32>
    %186 = vector.extract_strided_slice %182 {offsets = [0, 192], sizes = [8, 64], strides = [1, 1]} : vector<8x256xf32> to vector<8x64xf32>
    %187 = arith.mulf %184, %167 : vector<8x64xf32>
    %188 = arith.mulf %183, %185 : vector<8x64xf32>
    %189 = arith.addf %187, %188 : vector<8x64xf32>
    %190 = math.tanh %189 : vector<8x64xf32>
    %191 = arith.mulf %186, %190 : vector<8x64xf32>
    %192 = arith.maximumf %170, %191 : vector<8x64xf32>
    %193 = vector.extract_strided_slice %192 {offsets = [0, 0], sizes = [4, 64], strides = [1, 1]} : vector<8x64xf32> to vector<4x64xf32>
    %194 = vector.extract_strided_slice %192 {offsets = [4, 0], sizes = [4, 64], strides = [1, 1]} : vector<8x64xf32> to vector<4x64xf32>
    %195 = arith.subf %193, %194 : vector<4x64xf32>
    %196 = math.absf %195 : vector<4x64xf32>
    %197 = arith.mulf %193, %194 : vector<4x64xf32>
    %198 = tpu.concatenate %193, %194, %196, %197 in 1 : vector<4x64xf32>, vector<4x64xf32>, vector<4x64xf32>, vector<4x64xf32> -> vector<4x256xf32>
    %199 = arith.truncf %198 : vector<4x256xf32> to vector<4x256xbf16>
    %c0_33 = arith.constant 0 : index
    %c0_34 = arith.constant 0 : index
    %200 = vector.load %arg2[%c0_33, %c0_34] : memref<256x64xbf16, #tpu.memory_space<vmem>>, vector<256x64xbf16>
    %cst_35 = arith.constant dense<0.000000e+00> : vector<4x64xf32>
    %201 = tpu.matmul %199, %200, %cst_35 {dimension_numbers = #tpu.dot_dimension_numbers<[1], [0], [0], [1], [0, 0, 1, 1], [], []>} : vector<4x256xbf16>, vector<256x64xbf16>, vector<4x64xf32> -> vector<4x64xf32>
    %202 = vector.broadcast %8 : vector<1x64xf32> to vector<4x64xf32>
    %203 = arith.addf %201, %202 : vector<4x64xf32>
    %cst_36 = arith.constant 0.000000e+00 : f32
    %204 = vector.broadcast %cst_36 : f32 to vector<4x64xf32>
    %205 = arith.maximumf %203, %204 : vector<4x64xf32>
    %206 = arith.truncf %205 : vector<4x64xf32> to vector<4x64xbf16>
    %c0_37 = arith.constant 0 : index
    %c0_38 = arith.constant 0 : index
    %207 = vector.load %arg3[%c0_37, %c0_38] : memref<64x3xbf16, #tpu.memory_space<vmem>>, vector<64x3xbf16>
    %cst_39 = arith.constant dense<0.000000e+00> : vector<4x3xf32>
    %208 = tpu.matmul %206, %207, %cst_39 {dimension_numbers = #tpu.dot_dimension_numbers<[1], [0], [0], [1], [0, 0, 1, 1], [], []>} : vector<4x64xbf16>, vector<64x3xbf16>, vector<4x3xf32> -> vector<4x3xf32>
    %209 = vector.broadcast %9 : vector<1x3xf32> to vector<4x3xf32>
    %210 = arith.addf %208, %209 : vector<4x3xf32>
    %cst_40 = arith.constant dense<0xFF800000> : vector<4xf32>
    %211 = vector.multi_reduction <maximumf>, %210, %cst_40 [1] : vector<4x3xf32> to vector<4xf32>
    %212 = vector.shape_cast %211 : vector<4xf32> to vector<4x1xf32>
    %213 = vector.broadcast %212 : vector<4x1xf32> to vector<4x3xf32>
    %214 = arith.subf %210, %213 : vector<4x3xf32>
    %215 = math.exp %214 : vector<4x3xf32>
    %cst_41 = arith.constant dense<0.000000e+00> : vector<4xf32>
    %216 = vector.multi_reduction <add>, %215, %cst_41 [1] : vector<4x3xf32> to vector<4xf32>
    %217 = vector.shape_cast %216 : vector<4xf32> to vector<4x1xf32>
    %218 = math.log %217 : vector<4x1xf32>
    %219 = arith.addf %218, %212 : vector<4x1xf32>
    %220 = arith.mulf %210, %10 : vector<4x3xf32>
    %cst_42 = arith.constant dense<0.000000e+00> : vector<4xf32>
    %221 = vector.multi_reduction <add>, %220, %cst_42 [1] : vector<4x3xf32> to vector<4xf32>
    %222 = vector.shape_cast %221 : vector<4xf32> to vector<4x1xf32>
    %223 = arith.subf %219, %222 : vector<4x1xf32>
    %cst_43 = arith.constant dense<0.000000e+00> : vector<1xf32>
    %224 = vector.multi_reduction <add>, %223, %cst_43 [0] : vector<4x1xf32> to vector<1xf32>
    %225 = vector.shape_cast %224 : vector<1xf32> to vector<1x1xf32>
    %cst_44 = arith.constant 2.500000e-01 : f32
    %226 = vector.broadcast %cst_44 : f32 to vector<1x1xf32>
    %227 = arith.mulf %225, %226 : vector<1x1xf32>
    %cst_45 = arith.constant 0.000000e+00 : f32
    %228 = vector.broadcast %cst_45 : f32 to vector<4x125xf32>
    %229 = tpu.concatenate %210, %228 in 1 : vector<4x3xf32>, vector<4x125xf32> -> vector<4x128xf32>
    %230 = vector.shape_cast %227 : vector<1x1xf32> to vector<1x1xf32>
    %231 = vector.broadcast %230 : vector<1x1xf32> to vector<1x128xf32>
    %cst_46 = arith.constant 0.000000e+00 : f32
    %232 = vector.broadcast %cst_46 : f32 to vector<3x128xf32>
    %233 = tpu.concatenate %229, %231, %232 in 0 : vector<4x128xf32>, vector<1x128xf32>, vector<3x128xf32> -> vector<8x128xf32>
    %c0_47 = arith.constant 0 : index
    %c0_48 = arith.constant 0 : index
    %234 = vector.load %arg5[%c0_47, %c0_48] : memref<8x128xf32, #tpu.memory_space<vmem>>, vector<8x128xf32>
    tpu.vector_store %arg5[%c0_47, %c0_48], %233 {strides = array<i32>} : memref<8x128xf32, #tpu.memory_space<vmem>>, vector<8x128xf32>,
    return
  }
}

</mosaic_0001>

<bundles_post_ra>
// kernel: snli_forward.1
= control target key start
LH: loop header
LB: loop body
LE: loop exit
PB: predicated region body
PF: predicated region fallthrough
CT: control target
= control target key end

     0   :  { %vm89_vm0 = vcmask 261120   ;;  %v1267_v52 = vmov 0   ;;  %vm282_vm1 = vcmask 523264   ;;  %vm937_vm2 = vcmask 19456   ;;  %s1661_s1 = inlined_call_operand.vmem [shape: bf16[128,256], index: 1, kind: input, shape index: {}]   ;;  %s1662_s0 = inlined_call_operand.vmem [shape: bf16[64,32], index: 0, kind: input, shape index: {}]   ;;  %s1663_s4 = inlined_call_operand.vmem [shape: f32[8,256], index: 4, kind: input, shape index: {}]   ;;  %s1664_s2 = inlined_call_operand.vmem [shape: bf16[256,64], index: 2, kind: input, shape index: {}]   ;;  %s1665_s3 = inlined_call_operand.vmem [shape: bf16[64,3], index: 3, kind: input, shape index: {}]   ;;  %s1666_s5 = inlined_call_operand.vmem [shape: f32[8,128], index: 5, kind: output, shape index: {}]  }
   0x1   :  { %v1003_v0 = vld [vmem:[%s1661_s1 + $0x10] sm:$0xf]  ;;  %v1171_v1 = vld [vmem:[%s1661_s1 + $0x14] sm:$0xf0]  ;;  %v1170_v2 = vld [vmem:[%s1661_s1 + $0x14] sm:$0xf] }
   0x2   :  { %v1004_v3 = vor.u32 %v1171_v1, %v1003_v0  ;;  %v1005_v4 = vld [vmem:[%s1661_s1 + $0x18] sm:$0xf0]  ;;  %v1027_v5 = vld [vmem:[%s1661_s1 + $0x30] sm:$0xf]  ;;  %v1175_v6 = vld [vmem:[%s1661_s1 + $0x34] sm:$0xf0] }
   0x3   :  { %v1008_v7 = vor.u32 %v1170_v2, %v1005_v4  ;;  %v1028_v8 = vor.u32 %v1175_v6, %v1027_v5  ;;  %v1174_v9 = vld [vmem:[%s1661_s1 + $0x34] sm:$0xf]  ;;  %v1029_v10 = vld [vmem:[%s1661_s1 + $0x38] sm:$0xf0]  ;;  %v995_v11 = vld [vmem:[%s1661_s1] sm:$0xf] }
   0x4   :  { %108 = vmatpush.bf16.msra.mxu0 %v1004_v3  ;;  %v1032_v12 = vor.u32 %v1174_v9, %v1029_v10  ;;  %v1169_v13 = vld [vmem:[%s1661_s1 + $0x4] sm:$0xf0]  ;;  %v1168_v14 = vld [vmem:[%s1661_s1 + $0x4] sm:$0xf]  ;;  %v997_v15 = vld [vmem:[%s1661_s1 + $0x8] sm:$0xf0] }
   0x5   :  { %137 = vmatpush.bf16.msra.mxu1 %v1008_v7  ;;  %186 = vmatpush.bf16.msra.mxu2 %v1028_v8  ;;  %v996_v16 = vor.u32 %v1169_v13, %v995_v11  ;;  %v1000_v17 = vor.u32 %v1168_v14, %v997_v15  ;;  %v1019_v18 = vld [vmem:[%s1661_s1 + $0x20] sm:$0xf]  ;;  %v1173_v19 = vld [vmem:[%s1661_s1 + $0x24] sm:$0xf0]  ;;  %v1172_v20 = vld [vmem:[%s1661_s1 + $0x24] sm:$0xf] }
   0x6   :  { %215 = vmatpush.bf16.msra.mxu3 %v1032_v12  ;;  %v1020_v21 = vor.u32 %v1173_v19, %v1019_v18  ;;  %v1021_v22 = vld [vmem:[%s1661_s1 + $0x28] sm:$0xf0]  ;;  %v1184_v23 = vld [vmem:[%s1662_s0] sm:$0xff]  ;;  %v1067_v24 = vld [vmem:[%s1661_s1 + $0x70] sm:$0xf]  ;;  %vm958_vm3 = vcmask 1043456  }
   0x7   :  { %v1024_v25 = vor.u32 %v1172_v20, %v1021_v22  ;;  %v1183_v26 = vld [vmem:[%s1661_s1 + $0x74] sm:$0xf0]  ;;  %v1182_v27 = vld [vmem:[%s1661_s1 + $0x74] sm:$0xf]  ;;  %v1069_v28 = vld [vmem:[%s1661_s1 + $0x78] sm:$0xf0] }
   0x8   :  { %109 = vmatpush.bf16.msra.mxu0 %v996_v16  ;;  %v1362_v29 = vor.u32 %v1183_v26, %v1067_v24  ;;  %v1364_v30 = vor.u32 %v1182_v27, %v1069_v28  ;;  %v1059_v31 = vld [vmem:[%s1661_s1 + $0x60] sm:$0xf]  ;;  %v1181_v32 = vld [vmem:[%s1661_s1 + $0x64] sm:$0xf0]  ;;  %v1180_v33 = vld [vmem:[%s1661_s1 + $0x64] sm:$0xf] }
   0x9   :  { %138 = vmatpush.bf16.msra.mxu1 %v1000_v17  ;;  %187 = vmatpush.bf16.msra.mxu2 %v1020_v21  ;;  %v1061_v34 = vld [vmem:[%s1661_s1 + $0x68] sm:$0xf0]  ;;  %v1383_v36 = vor.u32 %v1181_v32, %v1059_v31  ;;  %v1051_v37 = vld [vmem:[%s1661_s1 + $0x50] sm:$0xf]  ;;  %v1179_v38 = vld [vmem:[%s1661_s1 + $0x54] sm:$0xf0] }
   0xa   :  { %216 = vmatpush.bf16.msra.mxu3 %v1024_v25  ;;  %v1379_v35 = vor.u32 %v1180_v33, %v1061_v34  ;;  %v1178_v39 = vld [vmem:[%s1661_s1 + $0x54] sm:$0xf]  ;;  %v1053_v40 = vld [vmem:[%s1661_s1 + $0x58] sm:$0xf0]  ;;  %v1404_v41 = vor.u32 %v1179_v38, %v1051_v37  ;;  %v1185_v43 = vld [vmem:[%s1662_s0 + $0x8] sm:$0xff]  ;;  %vm967_vm4 = vcmask 23552  }
   0xb   :  { %1009 = vmatmul.msk.bf16.vlgmr.msra.gmra.mxu0 %vm89_vm0, %v1184_v23  ;;  %v1406_v42 = vor.u32 %v1178_v39, %v1053_v40  ;;  %v1043_v44 = vld [vmem:[%s1661_s1 + $0x40] sm:$0xf]  ;;  %v1177_v45 = vld [vmem:[%s1661_s1 + $0x44] sm:$0xf0]  ;;  %v1176_v46 = vld [vmem:[%s1661_s1 + $0x44] sm:$0xf] }
   0xc   :  { %1013 = vmatmul.msk.bf16.vlgmr.msra.gmra.mxu1 %vm89_vm0, %v1184_v23  ;;  %1033 = vmatmul.msk.bf16.vlgmr.msra.gmra.mxu2 %vm89_vm0, %v1184_v23  ;;  %v1430_v47 = vor.u32 %v1177_v45, %v1043_v44  ;;  %v1045_v48 = vld [vmem:[%s1661_s1 + $0x48] sm:$0xf0]  ;;  %v1186_v50 = vld [vmem:[%s1662_s0 + $0x10] sm:$0xff]  ;;  %v1187_v51 = vld [vmem:[%s1662_s0 + $0x18] sm:$0xff]  ;;  %vm970_vm5 = vcmask 1044480  }
   0xd   :  { %303 = vmatpush.bf16.msrb.mxu1 %v1364_v30  ;;  %1037 = vmatmul.msk.bf16.vlgmr.msra.gmra.mxu3 %vm89_vm0, %v1184_v23  ;;  %v1435_v49 = vor.u32 %v1176_v46, %v1045_v48  ;;  %v1486_v3 = vld [vmem:[%s1663_s4] sm:$0xff]  ;;  %v38_v4 = vld [vmem:[%s1663_s4 + $0x8] sm:$0xff]  ;;  %s1268_s4 = smov 64  }
   0xe   :  { %290 = vmatpush.bf16.msrb.mxu3 %v1362_v29  ;;  %344 = vmatpush.bf16.msrb.mxu2 %v1362_v29  ;;  %v39_v6 = vperm.slane %v1486_v3, 0  ;;  %v40_v9 = vperm.slane %v38_v4, 0 }
   0xf   :  { %399 = vmatpush.bf16.msrb.mxu0 %v1362_v29 }
  0x11   :  { %304 = vmatpush.bf16.msrb.mxu1 %v1379_v35 }
  0x12   :  { %291 = vmatpush.bf16.msrb.mxu3 %v1383_v36  ;;  %345 = vmatpush.bf16.msrb.mxu2 %v1383_v36 }
  0x13   :  { %400 = vmatpush.bf16.msrb.mxu0 %v1383_v36 }
  0x15   :  { %305 = vmatpush.bf16.msrb.mxu1 %v1406_v42 }
  0x16   :  { %292 = vmatpush.bf16.msrb.mxu3 %v1404_v41  ;;  %346 = vmatpush.bf16.msrb.mxu2 %v1404_v41 }
  0x17   :  { %401 = vmatpush.bf16.msrb.mxu0 %v1404_v41 }
  0x19   :  { %306 = vmatpush.bf16.msrb.mxu1 %v1435_v49 }
  0x1a   :  { %293 = vmatpush.bf16.msrb.mxu3 %v1430_v47  ;;  %347 = vmatpush.bf16.msrb.mxu2 %v1430_v47 }
  0x1b   :  { %1010 = vmatmul.msk.bf16.gmra.mxu0 %vm89_vm0, %v1185_v43 }
  0x1c   :  { %1014 = vmatmul.msk.bf16.gmra.mxu1 %vm89_vm0, %v1185_v43  ;;  %1034 = vmatmul.msk.bf16.gmra.mxu2 %vm89_vm0, %v1185_v43 }
  0x1d   :  { %1038 = vmatmul.msk.bf16.gmra.mxu3 %vm89_vm0, %v1185_v43  ;;  %402 = vmatpush.bf16.msrb.mxu0 %v1430_v47 }
  0x1e   :  { %357 = vmatpush.bf16.msra.mxu3 %v1364_v30  ;;  %412 = vmatpush.bf16.msra.mxu1 %v1364_v30 }
  0x1f   :  { %454 = vmatpush.bf16.msra.mxu2 %v1362_v29 }
  0x21   :  { %509 = vmatpush.bf16.msra.mxu0 %v1362_v29 }
  0x22   :  { %358 = vmatpush.bf16.msra.mxu3 %v1379_v35  ;;  %413 = vmatpush.bf16.msra.mxu1 %v1379_v35 }
  0x23   :  { %455 = vmatpush.bf16.msra.mxu2 %v1383_v36 }
  0x25   :  { %510 = vmatpush.bf16.msra.mxu0 %v1383_v36 }
  0x26   :  { %359 = vmatpush.bf16.msra.mxu3 %v1406_v42  ;;  %414 = vmatpush.bf16.msra.mxu1 %v1406_v42 }
  0x27   :  { %456 = vmatpush.bf16.msra.mxu2 %v1404_v41 }
  0x29   :  { %511 = vmatpush.bf16.msra.mxu0 %v1404_v41 }
  0x2a   :  { %360 = vmatpush.bf16.msra.mxu3 %v1435_v49  ;;  %415 = vmatpush.bf16.msra.mxu1 %v1435_v49 }
  0x2b   :  { %1011 = vmatmul.msk.bf16.gmra.mxu0 %vm89_vm0, %v1186_v50  ;;  %457 = vmatpush.bf16.msra.mxu2 %v1430_v47 }
  0x2c   :  { %1015 = vmatmul.msk.bf16.gmra.mxu1 %vm89_vm0, %v1186_v50  ;;  %1035 = vmatmul.msk.bf16.gmra.mxu2 %vm89_vm0, %v1186_v50 }
  0x2d   :  { %1039 = vmatmul.msk.bf16.gmra.mxu3 %vm89_vm0, %v1186_v50  ;;  %512 = vmatpush.bf16.msra.mxu0 %v1430_v47 }
  0x3b   :  { %1012 = vmatmul.msk.bf16.gmra.mxu0 %vm89_vm0, %v1187_v51 }
  0x3c   :  { %1016 = vmatmul.msk.bf16.gmra.mxu1 %vm89_vm0, %v1187_v51  ;;  %1036 = vmatmul.msk.bf16.gmra.mxu2 %vm89_vm0, %v1187_v51 }
  0x3d   :  { %1040 = vmatmul.msk.bf16.gmra.mxu3 %vm89_vm0, %v1187_v51 }
  0x4c   :  { %307 = vmatmul.bf16.vlgmr.msrb.gmra.mxu1 %v1267_v52 }
  0x4d   :  { %294 = vmatmul.bf16.vlgmr.msrb.gmra.mxu3 %v1267_v52  ;;  %522 = vmatpush.bf16.msrb.mxu1 %v1364_v30 }
  0x4e   :  { %467 = vmatpush.bf16.msrb.mxu3 %v1364_v30 }
  0x51   :  { %523 = vmatpush.bf16.msrb.mxu1 %v1379_v35 }
  0x52   :  { %468 = vmatpush.bf16.msrb.mxu3 %v1379_v35 }
  0x55   :  { %524 = vmatpush.bf16.msrb.mxu1 %v1406_v42 }
  0x56   :  { %469 = vmatpush.bf16.msrb.mxu3 %v1406_v42 }
  0x59   :  { %525 = vmatpush.bf16.msrb.mxu1 %v1435_v49 }
  0x5a   :  { %470 = vmatpush.bf16.msrb.mxu3 %v1435_v49 }
  0x88   :  { %v1479_v53 = vpop.f32.mrf.mxu0 }
  0x89   :  { %v1481_v54 = vpop.f32.mrf.mxu1 }
  0x8f   :  { %v189_v55 = vpop.f32.mrf.mxu2 }
  0x90   :  { %v218_v56 = vpop.f32.mrf.mxu3  ;;  %v113_v57 = vpop.f32.mrf.mxu0 }
  0x91   :  { %v142_v58 = vpop.f32.mrf.mxu1 }
  0x97   :  { %v191_v59 = vpop.f32.mrf.mxu2 }
  0x98   :  { %v220_v60 = vpop.f32.mrf.mxu3  ;;  %v116_v61 = vpop.f32.mrf.mxu0 }
  0x99   :  { %v145_v62 = vpop.f32.mrf.mxu1 }
  0x9f   :  { %v194_v63 = vpop.f32.mrf.mxu2 }
  0xa0   :  { %v223_v0 = vpop.f32.mrf.mxu3  ;;  %v118_v1 = vpop.f32.mrf.mxu0 }
  0xa1   :  { %v147_v2 = vpop.f32.mrf.mxu1 }
  0xa7   :  { %v196_v5 = vpop.f32.mrf.mxu2 }
  0xa8   :  { %v225_v7 = vpop.f32.mrf.mxu3  ;;  %v121_v8 = vpop.f32.mrf.mxu0 }
  0xa9   :  { %v494_v10 = vadd.f32 %v196_v5, %v121_v8  ;;  %v150_v11 = vpop.f32.mrf.mxu1 }
  0xaa   :  { %v495_v12 = vadd.f32 %v225_v7, %v150_v11 }
  0xab   :  { %v1492_v13 = vadd.f32 %v494_v10, %v39_v6 }
  0xac   :  { %v1494_v14 = vadd.f32 %v495_v12, %v40_v9 }
  0xaf   :  { %v199_v15 = vpop.f32.mrf.mxu2 }
  0xb0   :  { %v439_v16 = vadd.f32 %v199_v15, %v118_v1  ;;  %v228_v17 = vpop.f32.mrf.mxu3  ;;  %v123_v18 = vpop.f32.mrf.mxu0 }
  0xb1   :  { %v440_v19 = vadd.f32 %v228_v17, %v147_v2  ;;  %v549_v20 = vadd.f32 %v194_v63, %v123_v18  ;;  %v152_v21 = vpop.f32.mrf.mxu1 }
  0xb2   :  { %v550_v22 = vadd.f32 %v223_v0, %v152_v21  ;;  %v1496_v23 = vadd.f32 %v439_v16, %v39_v6 }
  0xb3   :  { %v1498_v24 = vadd.f32 %v440_v19, %v40_v9  ;;  %v1500_v25 = vadd.f32 %v549_v20, %v39_v6 }
  0xb4   :  { %v1502_v26 = vadd.f32 %v550_v22, %v40_v9 }
  0xb7   :  { %v201_v27 = vpop.f32.mrf.mxu2 }
  0xb8   :  { %v384_v28 = vadd.f32 %v201_v27, %v116_v61  ;;  %v230_v31 = vpop.f32.mrf.mxu3  ;;  %v126_v32 = vpop.f32.mrf.mxu0 }
  0xb9   :  { %v385_v33 = vadd.f32 %v230_v31, %v145_v62  ;;  %v604_v34 = vadd.f32 %v191_v59, %v126_v32  ;;  %v155_v37 = vpop.f32.mrf.mxu1 }
  0xba   :  { %v605_v38 = vadd.f32 %v220_v60, %v155_v37  ;;  %v1504_v39 = vadd.f32 %v384_v28, %v39_v6 }
  0xbb   :  { %v1506_v40 = vadd.f32 %v385_v33, %v40_v9  ;;  %v1508_v43 = vadd.f32 %v604_v34, %v39_v6 }
  0xbc   :  { %v1510_v44 = vadd.f32 %v605_v38, %v40_v9 }
  0xbf   :  { %v204_v45 = vpop.f32.mrf.mxu2 }
  0xc0   :  { %v329_v46 = vadd.f32 %v204_v45, %v113_v57  ;;  %v233_v48 = vpop.f32.mrf.mxu3  ;;  %v128_v50 = vpop.f32.mrf.mxu0 }
  0xc1   :  { %v330_v51 = vadd.f32 %v233_v48, %v142_v58  ;;  %v659_v52 = vadd.f32 %v189_v55, %v128_v50  ;;  %v157_v61 = vpop.f32.mrf.mxu1 }
  0xc2   :  { %v660_v63 = vadd.f32 %v218_v56, %v157_v61  ;;  %v331_v62 = vadd.f32 %v329_v46, %v39_v6 }
  0xc3   :  { %v332_v59 = vadd.f32 %v330_v51, %v40_v9  ;;  %v1512_v0 = vadd.f32 %v659_v52, %v39_v6 }
  0xc4   :  { %v1514_v60 = vadd.f32 %v660_v63, %v40_v9 }
  0xc7   :  { %v206_v1 = vpop.f32.mrf.mxu2 }
  0xc8   :  { %v235_v2 = vpop.f32.mrf.mxu3  ;;  %v238_v5 = vadd.f32 %v206_v1, %v1479_v53 }
  0xc9   :  { %v308_v4 = vpop.f32.mrf.mxu1  ;;  %v239_v7 = vadd.f32 %v235_v2, %v1481_v54 }
  0xca   :  { %v240_v8 = vadd.f32 %v238_v5, %v39_v6 }
  0xcb   :  { %v241_v57 = vadd.f32 %v239_v7, %v40_v9 }
  0xcd   :  { %v313_v11 = vadd.f32 %v308_v4, %v241_v57 }
  0xd0   :  { %v295_v10 = vpop.f32.mrf.mxu3 }
  0xd1   :  { %v312_v58 = vadd.f32 %v295_v10, %v240_v8  ;;  %v310_v55 = vpop.f32.mrf.mxu1 }
  0xd3   :  { %1215 = vtanh.f32 %v312_v58 }
  0xd4   :  { %1217 = vtanh.f32 %v313_v11 }
  0xd8   :  { %v297_v56 = vpop.f32.mrf.mxu3 }
  0xd9   :  { %v1216_v12 = vpop.eup %1215 }
  0xda   :  { %v316_v15 = vmul.f32 0.5, %v1216_v12  ;;  %v1218_v17 = vpop.eup %1217 }
  0xdb   :  { %v317_v6 = vmul.f32 0.5, %v1218_v17 }
  0xdc   :  { %v318_v16 = vadd.f32 0.5, %v316_v15 }
  0xdd   :  { %v319_v9 = vadd.f32 0.5, %v317_v6 }
  0xde   :  { %v321_v18 = vmul.f32 %v1218_v17, %v318_v16  ;;  %v320_v53 = vmul.f32 0.0, %v318_v16 }
  0xe0   :  { %323 = vrot.lane.b32.xlu0 %v321_v18, %s1268_s4 }
 0x152   :  { %v324_v19 = vpop.permute.xlu0 %323 }
 0x153   :  { %v326_v54 = vadd.f32 %v324_v19, %v320_v53 }
 0x155   :  { %1219 = vtanh.f32 %v326_v54 }
 0x15b   :  { %v1220_v20 = vpop.eup %1219 }
 0x15c   :  { %v1519_v21 = vmul.f32 %v1220_v20, %v319_v9 }
 0x15e   :  { %v333_v22 = vpack.c.bf16 %v1519_v21, %v1519_v21 }
 0x160   :  { %335 = vrot.lane.b32.xlu0 %v333_v22, %s1268_s4 }
 0x1d2   :  { %v336_v27 = vpop.permute.xlu0 %335 }
 0x1d3   :  { %1073 = vmatmul.msk.bf16.vlgmr.msrb.gmra.mxu2 %vm282_vm1, %v336_v27  ;;  %1074 = vmatmul.msk.bf16.vlgmr.msra.gmra.mxu3 %vm282_vm1, %v336_v27 }
 0x1d4   :  { %564 = vmatpush.bf16.msrb.mxu2 %v1362_v29  ;;  %577 = vmatpush.bf16.msra.mxu3 %v1364_v30 }
 0x1d8   :  { %565 = vmatpush.bf16.msrb.mxu2 %v1383_v36  ;;  %578 = vmatpush.bf16.msra.mxu3 %v1379_v35 }
 0x1dc   :  { %566 = vmatpush.bf16.msrb.mxu2 %v1404_v41  ;;  %579 = vmatpush.bf16.msra.mxu3 %v1406_v42 }
 0x1e0   :  { %567 = vmatpush.bf16.msrb.mxu2 %v1430_v47  ;;  %580 = vmatpush.bf16.msra.mxu3 %v1435_v49 }
 0x256   :  { %v349_v28 = vpop.f32.mrf.mxu2  ;;  %v362_v31 = vpop.f32.mrf.mxu3 }
 0x257   :  { %v366_v32 = vadd.f32 %v349_v28, %v331_v62  ;;  %v367_v33 = vadd.f32 %v362_v31, %v332_v59 }
 0x259   :  { %1221 = vtanh.f32 %v366_v32 }
 0x25a   :  { %1223 = vtanh.f32 %v367_v33 }
 0x25e   :  { %v351_v34 = vpop.f32.mrf.mxu2  ;;  %v364_v37 = vpop.f32.mrf.mxu3 }
 0x25f   :  { %v1222_v38 = vpop.eup %1221 }
 0x260   :  { %v370_v45 = vmul.f32 0.5, %v1222_v38  ;;  %v1224_v48 = vpop.eup %1223 }
 0x261   :  { %v371_v63 = vmul.f32 0.5, %v1224_v48 }
 0x262   :  { %v372_v46 = vadd.f32 0.5, %v370_v45 }
 0x263   :  { %v373_v1 = vadd.f32 0.5, %v371_v63 }
 0x264   :  { %v375_v50 = vmul.f32 %v1224_v48, %v372_v46  ;;  %v374_v51 = vmul.f32 %v372_v46, %v326_v54 }
 0x266   :  { %377 = vrot.lane.b32.xlu1 %v375_v50, %s1268_s4 }
 0x2d8   :  { %v378_v52 = vpop.permute.xlu1 %377 }
 0x2d9   :  { %v380_v61 = vadd.f32 %v378_v52, %v374_v51 }
 0x2db   :  { %1225 = vtanh.f32 %v380_v61 }
 0x2e1   :  { %v1226_v2 = vpop.eup %1225 }
 0x2e2   :  { %v382_v62 = vmul.f32 %v1226_v2, %v373_v1 }
 0x2e4   :  { %v388_v4 = vpack.c.bf16 %v382_v62, %v382_v62  ;;  %v383_v54 = vmax.f32 %v1519_v21, %v382_v62 }
 0x2e6   :  { %390 = vrot.lane.b32.xlu1 %v388_v4, %s1268_s4 }
 0x358   :  { %v391_v59 = vpop.permute.xlu1 %390 }
 0x359   :  { %1075 = vmatmul.msk.bf16.vlgmr.msrb.gmra.mxu0 %vm282_vm1, %v391_v59  ;;  %1076 = vmatmul.msk.bf16.vlgmr.msra.gmra.mxu1 %vm282_vm1, %v391_v59 }
 0x35a   :  { %619 = vmatpush.bf16.msrb.mxu0 %v1362_v29  ;;  %632 = vmatpush.bf16.msra.mxu1 %v1364_v30 }
 0x35e   :  { %620 = vmatpush.bf16.msrb.mxu0 %v1383_v36  ;;  %633 = vmatpush.bf16.msra.mxu1 %v1379_v35 }
 0x362   :  { %621 = vmatpush.bf16.msrb.mxu0 %v1404_v41  ;;  %634 = vmatpush.bf16.msra.mxu1 %v1406_v42 }
 0x366   :  { %622 = vmatpush.bf16.msrb.mxu0 %v1430_v47  ;;  %635 = vmatpush.bf16.msra.mxu1 %v1435_v49 }
 0x3d6   :  { %v404_v5 = vpop.f32.mrf.mxu0  ;;  %v417_v7 = vpop.f32.mrf.mxu1 }
 0x3d7   :  { %v421_v57 = vadd.f32 %v404_v5, %v1504_v39  ;;  %v422_v8 = vadd.f32 %v417_v7, %v1506_v40 }
 0x3d9   :  { %1227 = vtanh.f32 %v421_v57 }
 0x3da   :  { %1229 = vtanh.f32 %v422_v8 }
 0x3de   :  { %v406_v10 = vpop.f32.mrf.mxu0  ;;  %v419_v58 = vpop.f32.mrf.mxu1 }
 0x3df   :  { %v1228_v55 = vpop.eup %1227 }
 0x3e0   :  { %v425_v11 = vmul.f32 0.5, %v1228_v55  ;;  %v1230_v12 = vpop.eup %1229 }
 0x3e1   :  { %v426_v53 = vmul.f32 0.5, %v1230_v12 }
 0x3e2   :  { %v427_v56 = vadd.f32 0.5, %v425_v11 }
 0x3e3   :  { %v428_v19 = vadd.f32 0.5, %v426_v53 }
 0x3e4   :  { %v430_v15 = vmul.f32 %v1230_v12, %v427_v56  ;;  %v429_v16 = vmul.f32 %v427_v56, %v380_v61 }
 0x3e6   :  { %432 = vrot.lane.b32.xlu2 %v430_v15, %s1268_s4 }
 0x440   :  { %v433_v17 = vpop.permute.xlu2 %432 }
 0x441   :  { %v435_v18 = vadd.f32 %v433_v17, %v429_v16 }
 0x443   :  { %1231 = vtanh.f32 %v435_v18 }
 0x449   :  { %v1232_v39 = vpop.eup %1231 }
 0x44a   :  { %v437_v40 = vmul.f32 %v1232_v39, %v428_v19 }
 0x44c   :  { %v443_v6 = vpack.c.bf16 %v437_v40, %v437_v40  ;;  %v1550_v9 = vmax.f32 %v383_v54, %v437_v40 }
 0x44e   :  { %445 = vrot.lane.b32.xlu2 %v443_v6, %s1268_s4 }
 0x4a8   :  { %v446_v20 = vpop.permute.xlu2 %445 }
 0x4a9   :  { %1077 = vmatmul.msk.bf16.vlgmr.msra.gmra.mxu2 %vm282_vm1, %v446_v20  ;;  %1078 = vmatmul.msk.bf16.vlgmr.msrb.gmra.mxu3 %vm282_vm1, %v446_v20 }
 0x4aa   :  { %674 = vmatpush.bf16.msra.mxu2 %v1362_v29  ;;  %687 = vmatpush.bf16.msrb.mxu3 %v1364_v30 }
 0x4ae   :  { %675 = vmatpush.bf16.msra.mxu2 %v1383_v36  ;;  %688 = vmatpush.bf16.msrb.mxu3 %v1379_v35 }
 0x4b2   :  { %676 = vmatpush.bf16.msra.mxu2 %v1404_v41  ;;  %689 = vmatpush.bf16.msrb.mxu3 %v1406_v42 }
 0x4b6   :  { %677 = vmatpush.bf16.msra.mxu2 %v1430_v47  ;;  %690 = vmatpush.bf16.msrb.mxu3 %v1435_v49 }
 0x52c   :  { %v459_v21 = vpop.f32.mrf.mxu2  ;;  %v472_v22 = vpop.f32.mrf.mxu3 }
 0x52d   :  { %v476_v27 = vadd.f32 %v459_v21, %v1496_v23  ;;  %v477_v29 = vadd.f32 %v472_v22, %v1498_v24 }
 0x52f   :  { %1233 = vtanh.f32 %v476_v27 }
 0x530   :  { %1235 = vtanh.f32 %v477_v29 }
 0x534   :  { %v461_v30 = vpop.f32.mrf.mxu2  ;;  %v474_v36 = vpop.f32.mrf.mxu3 }
 0x535   :  { %v1234_v28 = vpop.eup %1233 }
 0x536   :  { %v480_v35 = vmul.f32 0.5, %v1234_v28  ;;  %v1236_v41 = vpop.eup %1235 }
 0x537   :  { %v481_v33 = vmul.f32 0.5, %v1236_v41 }
 0x538   :  { %v482_v31 = vadd.f32 0.5, %v480_v35 }
 0x539   :  { %v483_v34 = vadd.f32 0.5, %v481_v33 }
 0x53a   :  { %v485_v32 = vmul.f32 %v1236_v41, %v482_v31  ;;  %v484_v42 = vmul.f32 %v482_v31, %v435_v18 }
 0x53c   :  { %487 = vrot.lane.b32.xlu0 %v485_v32, %s1268_s4 }
 0x5ae   :  { %v488_v47 = vpop.permute.xlu0 %487 }
 0x5af   :  { %v490_v49 = vadd.f32 %v488_v47, %v484_v42 }
 0x5b1   :  { %1237 = vtanh.f32 %v490_v49 }
 0x5b7   :  { %v1238_v23 = vpop.eup %1237 }
 0x5b8   :  { %v492_v37 = vmul.f32 %v1238_v23, %v483_v34 }
 0x5ba   :  { %v498_v38 = vpack.c.bf16 %v492_v37, %v492_v37  ;;  %v493_v24 = vmax.f32 %v1550_v9, %v492_v37 }
 0x5bc   :  { %500 = vrot.lane.b32.xlu1 %v498_v38, %s1268_s4 }
 0x62e   :  { %v501_v45 = vpop.permute.xlu1 %500 }
 0x62f   :  { %1079 = vmatmul.msk.bf16.vlgmr.msra.gmra.mxu0 %vm282_vm1, %v501_v45  ;;  %1080 = vmatmul.msk.bf16.vlgmr.msrb.gmra.mxu1 %vm282_vm1, %v501_v45 }
 0x6ac   :  { %v514_v46 = vpop.f32.mrf.mxu0  ;;  %v527_v48 = vpop.f32.mrf.mxu1 }
 0x6ad   :  { %v531_v50 = vadd.f32 %v514_v46, %v1492_v13  ;;  %v532_v51 = vadd.f32 %v527_v48, %v1494_v14 }
 0x6af   :  { %1239 = vtanh.f32 %v531_v50 }
 0x6b0   :  { %1241 = vtanh.f32 %v532_v51 }
 0x6b4   :  { %v516_v52 = vpop.f32.mrf.mxu0  ;;  %v529_v61 = vpop.f32.mrf.mxu1 }
 0x6b5   :  { %v1240_v63 = vpop.eup %1239 }
 0x6b6   :  { %v535_v1 = vmul.f32 0.5, %v1240_v63  ;;  %v1242_v62 = vpop.eup %1241 }
 0x6b7   :  { %v536_v57 = vmul.f32 0.5, %v1242_v62 }
 0x6b8   :  { %v537_v2 = vadd.f32 0.5, %v535_v1 }
 0x6b9   :  { %v538_v8 = vadd.f32 0.5, %v536_v57  ;;  %v1202_v57 = vld [vmem:[%s1664_s2 + $0x70] sm:$0xff] }
 0x6ba   :  { %v540_v4 = vmul.f32 %v1242_v62, %v537_v2  ;;  %v539_v59 = vmul.f32 %v537_v2, %v490_v49 }
 0x6bc   :  { %542 = vrot.lane.b32.xlu2 %v540_v4, %s1268_s4 }
 0x716   :  { %v543_v5 = vpop.permute.xlu2 %542 }
 0x717   :  { %v545_v7 = vadd.f32 %v543_v5, %v539_v59 }
 0x719   :  { %1243 = vtanh.f32 %v545_v7 }
 0x71f   :  { %v1244_v13 = vpop.eup %1243 }
 0x720   :  { %v547_v10 = vmul.f32 %v1244_v13, %v538_v8  ;;  %v1193_v8 = vld [vmem:[%s1664_s2 + $0x28] sm:$0xff] }
 0x721   :  { %v1201_v13 = vld [vmem:[%s1664_s2 + $0x68] sm:$0xff] }
 0x722   :  { %v553_v58 = vpack.c.bf16 %v547_v10, %v547_v10  ;;  %v548_v14 = vmax.f32 %v493_v24, %v547_v10 }
 0x724   :  { %555 = vrot.lane.b32.xlu0 %v553_v58, %s1268_s4 }
 0x796   :  { %v556_v55 = vpop.permute.xlu0 %555 }
 0x797   :  { %1081 = vmatmul.msk.bf16.vlgmr.msrb.gmra.mxu2 %vm282_vm1, %v556_v55  ;;  %1082 = vmatmul.msk.bf16.vlgmr.msra.gmra.mxu3 %vm282_vm1, %v556_v55  ;;  %v1200_v55 = vld [vmem:[%s1664_s2 + $0x60] sm:$0xff] }
 0x81a   :  { %v569_v11 = vpop.f32.mrf.mxu2  ;;  %v582_v56 = vpop.f32.mrf.mxu3 }
 0x81b   :  { %v586_v12 = vadd.f32 %v569_v11, %v1500_v25  ;;  %v587_v15 = vadd.f32 %v582_v56, %v1502_v26 }
 0x81d   :  { %1245 = vtanh.f32 %v586_v12  ;;  %v1191_v12 = vld [vmem:[%s1664_s2 + $0x18] sm:$0xff] }
 0x81e   :  { %1247 = vtanh.f32 %v587_v15  ;;  %v1199_v15 = vld [vmem:[%s1664_s2 + $0x58] sm:$0xff] }
 0x822   :  { %v571_v16 = vpop.f32.mrf.mxu2  ;;  %v584_v17 = vpop.f32.mrf.mxu3 }
 0x823   :  { %v1246_v18 = vpop.eup %1245  ;;  %v1190_v17 = vld [vmem:[%s1664_s2 + $0x10] sm:$0xff] }
 0x824   :  { %v590_v53 = vmul.f32 0.5, %v1246_v18  ;;  %v1248_v39 = vpop.eup %1247  ;;  %v1198_v18 = vld [vmem:[%s1664_s2 + $0x50] sm:$0xff] }
 0x825   :  { %v591_v20 = vmul.f32 0.5, %v1248_v39 }
 0x826   :  { %v592_v19 = vadd.f32 0.5, %v590_v53 }
 0x827   :  { %v593_v21 = vadd.f32 0.5, %v591_v20 }
 0x828   :  { %v595_v54 = vmul.f32 %v1248_v39, %v592_v19  ;;  %v594_v40 = vmul.f32 %v592_v19, %v545_v7  ;;  %v1195_v7 = vld [vmem:[%s1664_s2 + $0x38] sm:$0xff] }
 0x829   :  { %860 = vmatpush.bf16.msra.mxu0 %v1195_v7 }
 0x82a   :  { %597 = vrot.lane.b32.xlu1 %v595_v54, %s1268_s4  ;;  %v1189_v54 = vld [vmem:[%s1664_s2 + $0x8] sm:$0xff] }
 0x89c   :  { %v598_v6 = vpop.permute.xlu1 %597 }
 0x89d   :  { %v600_v9 = vadd.f32 %v598_v6, %v594_v40  ;;  %v1197_v40 = vld [vmem:[%s1664_s2 + $0x48] sm:$0xff] }
 0x89f   :  { %1249 = vtanh.f32 %v600_v9 }
 0x8a5   :  { %v1250_v25 = vpop.eup %1249 }
 0x8a6   :  { %v602_v22 = vmul.f32 %v1250_v25, %v593_v21  ;;  %v1188_v25 = vld [vmem:[%s1664_s2] sm:$0xff] }
 0x8a8   :  { %v608_v27 = vpack.c.bf16 %v602_v22, %v602_v22  ;;  %v603_v26 = vmax.f32 %v548_v14, %v602_v22  ;;  %v1192_v14 = vld [vmem:[%s1664_s2 + $0x20] sm:$0xff] }
 0x8a9   :  { %v1196_v22 = vld [vmem:[%s1664_s2 + $0x40] sm:$0xff] }
 0x8aa   :  { %610 = vrot.lane.b32.xlu2 %v608_v27, %s1268_s4  ;;  %v1207_v27 = vld [vmem:[%s1665_s3 + $0x18] sm:$0xff] }
 0x8ab   :  { %928 = vmatpush.bf16.msrb.mxu2 %v1207_v27 }
 0x904   :  { %v611_v29 = vpop.permute.xlu2 %610 }
 0x905   :  { %1083 = vmatmul.msk.bf16.vlgmr.msrb.gmra.mxu0 %vm282_vm1, %v611_v29  ;;  %1084 = vmatmul.msk.bf16.vlgmr.msra.gmra.mxu1 %vm282_vm1, %v611_v29 }
 0x982   :  { %v624_v30 = vpop.f32.mrf.mxu0  ;;  %v637_v36 = vpop.f32.mrf.mxu1 }
 0x983   :  { %v641_v28 = vadd.f32 %v624_v30, %v1508_v43  ;;  %v642_v35 = vadd.f32 %v637_v36, %v1510_v44 }
 0x985   :  { %1251 = vtanh.f32 %v641_v28 }
 0x986   :  { %1253 = vtanh.f32 %v642_v35 }
 0x98a   :  { %v626_v31 = vpop.f32.mrf.mxu0  ;;  %v639_v41 = vpop.f32.mrf.mxu1 }
 0x98b   :  { %v1252_v32 = vpop.eup %1251 }
 0x98c   :  { %v645_v42 = vmul.f32 0.5, %v1252_v32  ;;  %v1254_v49 = vpop.eup %1253 }
 0x98d   :  { %v646_v38 = vmul.f32 0.5, %v1254_v49 }
 0x98e   :  { %v647_v47 = vadd.f32 0.5, %v645_v42  ;;  %v1205_v42 = vld [vmem:[%s1665_s3 + $0x8] sm:$0xff] }
 0x98f   :  { %v648_v24 = vadd.f32 0.5, %v646_v38 }
 0x990   :  { %v650_v33 = vmul.f32 %v1254_v49, %v647_v47  ;;  %v649_v34 = vmul.f32 %v647_v47, %v600_v9  ;;  %v1204_v47 = vld [vmem:[%s1665_s3] sm:$0xff]  ;;  %v763_v49 = vperm.slane %v1486_v3, 1 }
 0x992   :  { %652 = vrot.lane.b32.xlu0 %v650_v33, %s1268_s4 }
 0xa04   :  { %v653_v23 = vpop.permute.xlu0 %652 }
 0xa05   :  { %v655_v37 = vadd.f32 %v653_v23, %v649_v34 }
 0xa07   :  { %1255 = vtanh.f32 %v655_v37 }
 0xa0d   :  { %v1256_v43 = vpop.eup %1255 }
 0xa0e   :  { %v657_v45 = vmul.f32 %v1256_v43, %v648_v24 }
 0xa10   :  { %v663_v46 = vpack.c.bf16 %v657_v45, %v657_v45  ;;  %v658_v44 = vmax.f32 %v603_v26, %v657_v45  ;;  %v1206_v26 = vld [vmem:[%s1665_s3 + $0x10] sm:$0xff] }
 0xa11   :  { %929 = vmatpush.bf16.msrb.mxu2 %v1206_v26 }
 0xa12   :  { %665 = vrot.lane.b32.xlu1 %v663_v46, %s1268_s4  ;;  %v896_v46 = vperm.slane %v1486_v3, 2 }
 0xa15   :  { %930 = vmatpush.bf16.msrb.mxu2 %v1205_v42 }
 0xa19   :  { %931 = vmatpush.bf16.msrb.mxu2 %v1204_v47 }
 0xa84   :  { %v666_v48 = vpop.permute.xlu1 %665 }
 0xa85   :  { %1085 = vmatmul.msk.bf16.vlgmr.msra.gmra.mxu2 %vm282_vm1, %v666_v48  ;;  %1086 = vmatmul.msk.bf16.vlgmr.msrb.gmra.mxu3 %vm282_vm1, %v666_v48 }
 0xb08   :  { %v679_v50 = vpop.f32.mrf.mxu2  ;;  %v692_v51 = vpop.f32.mrf.mxu3 }
 0xb09   :  { %v696_v52 = vadd.f32 %v679_v50, %v1512_v0  ;;  %v697_v61 = vadd.f32 %v692_v51, %v1514_v60  ;;  %v1203_v0 = vld [vmem:[%s1664_s2 + $0x78] sm:$0xff]  ;;  %v1194_v60 = vld [vmem:[%s1664_s2 + $0x30] sm:$0xff] }
 0xb0a   :  { %873 = vmatpush.bf16.msrb.mxu1 %v1203_v0  ;;  %861 = vmatpush.bf16.msra.mxu0 %v1194_v60 }
 0xb0b   :  { %1257 = vtanh.f32 %v696_v52 }
 0xb0c   :  { %1259 = vtanh.f32 %v697_v61 }
 0xb0e   :  { %874 = vmatpush.bf16.msrb.mxu1 %v1202_v57  ;;  %862 = vmatpush.bf16.msra.mxu0 %v1193_v8 }
 0xb10   :  { %v681_v63 = vpop.f32.mrf.mxu2  ;;  %v694_v1 = vpop.f32.mrf.mxu3 }
 0xb11   :  { %v1258_v2 = vpop.eup %1257 }
 0xb12   :  { %v700_v62 = vmul.f32 0.5, %v1258_v2  ;;  %v1260_v59 = vpop.eup %1259  ;;  %875 = vmatpush.bf16.msrb.mxu1 %v1201_v13  ;;  %863 = vmatpush.bf16.msra.mxu0 %v1192_v14 }
 0xb13   :  { %v701_v56 = vmul.f32 0.5, %v1260_v59 }
 0xb14   :  { %v702_v4 = vadd.f32 0.5, %v700_v62 }
 0xb15   :  { %v703_v16 = vadd.f32 0.5, %v701_v56 }
 0xb16   :  { %v705_v5 = vmul.f32 %v1260_v59, %v702_v4  ;;  %v704_v10 = vmul.f32 %v702_v4, %v655_v37  ;;  %876 = vmatpush.bf16.msrb.mxu1 %v1200_v55  ;;  %864 = vmatpush.bf16.msra.mxu0 %v1191_v12 }
 0xb18   :  { %707 = vrot.lane.b32.xlu2 %v705_v5, %s1268_s4 }
 0xb1a   :  { %877 = vmatpush.bf16.msrb.mxu1 %v1199_v15  ;;  %865 = vmatpush.bf16.msra.mxu0 %v1190_v17 }
 0xb1e   :  { %878 = vmatpush.bf16.msrb.mxu1 %v1198_v18  ;;  %866 = vmatpush.bf16.msra.mxu0 %v1189_v54 }
 0xb22   :  { %879 = vmatpush.bf16.msrb.mxu1 %v1197_v40  ;;  %867 = vmatpush.bf16.msra.mxu0 %v1188_v25 }
 0xb26   :  { %880 = vmatpush.bf16.msrb.mxu1 %v1196_v22 }
 0xb72   :  { %v708_v58 = vpop.permute.xlu2 %707 }
 0xb73   :  { %v710_v11 = vadd.f32 %v708_v58, %v704_v10 }
 0xb75   :  { %1261 = vtanh.f32 %v710_v11 }
 0xb7b   :  { %v1262_v53 = vpop.eup %1261 }
 0xb7c   :  { %v712_v19 = vmul.f32 %v1262_v53, %v703_v16 }
 0xb7e   :  { %v713_v39 = vmax.f32 %v658_v44, %v712_v19  ;;  %v951_v44 = vrot.slane %v1486_v3, 3 }
 0xb80   :  { %v715_v6 = vrot.slane %v713_v39, 4 }
 0xb82   :  { %v717_v9 = vsub.f32 %v713_v39, %v715_v6  ;;  %v719_v30 = vmul.f32 %v715_v6, %v713_v39 }
 0xb84   :  { %v718_v20 = vand.u32 2147483647, %v717_v9 }
 0xb86   :  { %v1210_v21 = vpack.i.bf16 %v718_v20, %v713_v39 }
 0xb88   :  { %1211 = vrot.lane.b32.xlu0 %v1210_v21, %s1268_s4 }
 0xbfa   :  { %v1212_v29 = vpop.permute.xlu0 %1211 }
 0xbfb   :  { %v1214_v36 = vunpack.i.h.bf16 %v1212_v29  ;;  %v1213_v28 = vunpack.i.l.bf16 %v1212_v29 }
 0xbfd   :  { %v728_v35 = vsel %vm282_vm1, %v1214_v36, %v719_v30  ;;  %v727_v31 = vsel %vm282_vm1, %v1213_v28, %v715_v6 }
 0xbfe   :  { %v730_v41 = vpack.c.bf16 %v728_v35, %v728_v35  ;;  %v729_v32 = vpack.c.bf16 %v727_v31, %v727_v31 }
 0xc00   :  { %868 = vmatmul.bf16.vlgmr.msra.gmra.mxu0 %v729_v32  ;;  %881 = vmatmul.bf16.vlgmr.msrb.gmra.mxu1 %v730_v41 }
 0xc7d   :  { %v869_v33 = vpop.f32.mrf.mxu0  ;;  %v882_v34 = vpop.f32.mrf.mxu1 }
 0xc7e   :  { %v870_v23 = vadd.f32 %v869_v33, %v763_v49 }
 0xc80   :  { %v883_v37 = vadd.f32 %v882_v34, %v870_v23 }
 0xc82   :  { %v886_v38 = vmax.f32 %v883_v37, 0.0 }
 0xc84   :  { %v887_v24 = vpack.c.bf16 %v886_v38, %v886_v38 }
 0xc85   :  { %v871_v43 = vpop.f32.mrf.mxu0  ;;  %v884_v45 = vpop.f32.mrf.mxu1 }
 0xc86   :  { %1167 = vmatmul.msk.bf16.vlgmr.msrb.gmra.mxu2 %vm282_vm1, %v887_v24 }
 0xd09   :  { %v933_v48 = vpop.f32.mrf.mxu2 }
 0xd0a   :  { %v934_v50 = vadd.f32 %v933_v48, %v896_v46 }
 0xd0c   :  { %v938_v51 = vsel %vm937_vm2, %v934_v50, -inf  ;;  %v953_v52 = vmul.f32 %v951_v44, %v934_v50  ;;  %v968_v12 = vsel %vm967_vm4, %v934_v50, 0.0 }
 0xd0d   :  { %939 = vmax.xlane.f32.xlu1 %v938_v51 }
 0xd0e   :  { %v954_v61 = vsel %vm937_vm2, %v953_v52, 0.0 }
 0xd0f   :  { %955 = vadd.xlane.f32.xlu0 %v954_v61 }
 0xd11   :  { %v935_v63 = vpop.f32.mrf.mxu2 }
 0xd80   :  { %v940_v1 = vpop.xlane.xlu1 %939 }
 0xd81   :  { %v941_v2 = vsub.f32 %v934_v50, %v940_v1 }
 0xd82   :  { %v956_v60 = vpop.xlane.xlu0 %955 }
 0xd83   :  { %v942_v62 = vmul.f32 1.442695, %v941_v2 }
 0xd85   :  { %1263 = vpow2.f32 %v942_v62 }
 0xd8b   :  { %v1264_v4 = vpop.eup %1263 }
 0xd8c   :  { %v944_v59 = vsel %vm937_vm2, %v1264_v4, 0.0 }
 0xd8d   :  { %945 = vadd.xlane.f32.xlu2 %v944_v59 }
 0xe00   :  { %v946_v5 = vpop.xlane.xlu2 %945 }
 0xe01   :  { %1265 = vlog2.f32 %v946_v5 }
 0xe07   :  { %v1266_v7 = vpop.eup %1265 }
 0xe08   :  { %v948_v3 = vmul.f32 0.6931472, %v1266_v7 }
 0xe0a   :  { %v949_v0 = vadd.f32 %v948_v3, %v940_v1 }
 0xe0c   :  { %v957_v57 = vsub.f32 %v949_v0, %v956_v60 }
 0xe0e   :  { %v959_v8 = vsel %vm958_vm3, %v957_v57, 0.0 }
 0xe0f   :  { %v960_v13 = vrot.slane %v959_v8, 4 }
 0xe11   :  { %v961_v10 = vadd.f32 %v960_v13, %v959_v8 }
 0xe13   :  { %v962_v58 = vrot.slane %v961_v10, 2 }
 0xe15   :  { %v963_v14 = vadd.f32 %v962_v58, %v961_v10 }
 0xe17   :  { %v964_v55 = vrot.slane %v963_v14, 1 }
 0xe19   :  { %v965_v11 = vadd.f32 %v964_v55, %v963_v14 }
 0xe1b   :  { %v966_v56 = vmul.f32 0.25, %v965_v11 }
 0xe1d   :  { %v969_v15 = vsel %vm958_vm3, %v968_v12, %v966_v56 }
 0xe1e   :  { %v971_v16 = vsel %vm970_vm5, %v969_v15, 0.0 }
 0xe1f   :  { %972 = vst [vmem:[%s1666_s5] sm:$0xff] %v971_v16 }

</bundles_post_ra>
